<compile_context>
chip_gen: v7x
topology: tpu7x:2x2x1
jax: 0.10.0
libtpu: 0.0.40
codegen_flags: <defaults>
</compile_context>

<pallas_src>
import functools

import jax
import jax.numpy as jnp
from jax.experimental import pallas as pl
from jax.experimental.pallas import tpu as pltpu


def peg_kernel(x_ref, w_ref, b_ref, o_ref, *, H, W):
    """One (batch-tile, channel-block) tile per grid step.

    x_ref: (BT, CB, H*W)  input tile, spatial flattened onto the lane axis
    w_ref: (CB, 9)        depthwise 3x3 weights, tap index last (row-major ky,kx)
    b_ref: (CB, 1)        conv bias
    o_ref: (BT, CB, H*W)  output tile
    """
    HW = H * W
    x = x_ref[...]                               # keep storage dtype resident
    w = w_ref[...].astype(jnp.float32)           # (CB, 9)  -- hoisted
    b = b_ref[...].astype(jnp.float32)           # (CB, 1), broadcasts over HW

    # Row / column boundary masks along the flattened spatial axis.  Built once
    # per grid step and hoisted above the 9-tap loop.
    pos = jax.lax.broadcasted_iota(jnp.int32, (1, 1, HW), 2)
    col = pos % W
    col_ok = {-1: col > 0, 0: None, 1: col < W - 1}          # x+dx in [0, W)
    row_ok = {-1: pos >= W, 0: None, 1: pos < (H - 1) * W}   # y+dy in [0, H)

    # residual + bias; f32 accumulation regardless of storage dtype.
    acc = x.astype(jnp.float32) + b

    # 3x3 SAME depthwise conv = 9 lane-rolls of the resident tile + masked FMA.
    for dy in (-1, 0, 1):
        for dx in (-1, 0, 1):
            k = (dy + 1) * 3 + (dx + 1)          # tap index into (CB, 9)
            off = dy * W + dx                    # flat-index offset of the tap
            shift = (-off) % HW                  # roll so tap[p] = x[p + off]
            tap = x if shift == 0 else pltpu.roll(x, shift=shift, axis=2)
            tap = tap.astype(jnp.float32)

            mask = col_ok[dx]
            if row_ok[dy] is not None:
                mask = row_ok[dy] if mask is None else jnp.logical_and(mask, row_ok[dy])
            if mask is not None:
                tap = jnp.where(mask, tap, 0.0)  # zero-padding + no row wrap

            acc = acc + tap * w[:, k:k + 1]      # (CB,1) per-channel splat

    o_ref[...] = acc.astype(o_ref.dtype)


def peg_forward(x_nchw, weight_oihw, bias, *, channel_block=None, batch_block=None):
    """PEG forward (depthwise 3x3 conv + bias + residual). NCHW in / NCHW out.

    x_nchw:      (B, C, H, W)
    weight_oihw: (C, 1, 3, 3)   (PyTorch depthwise conv weight)
    bias:        (C,)
    """
    B, C, H, W = x_nchw.shape
    HW = H * W
    itemsize = jnp.dtype(x_nchw.dtype).itemsize

    # ---- channel block: keep one channel-slab <= ~2 MiB of f32 --------------
    if channel_block is None:
        cb = C
        while cb * HW * 4 > 2 * 1024 * 1024 and cb % 2 == 0 and (cb // 2) % 8 == 0:
            cb //= 2
        channel_block = cb
    CB = channel_block
    n_cb = pl.cdiv(C, CB)

    # ---- batch tile: grow per-step block toward ~1-2 MiB, keep >=2 steps ----
    if batch_block is None:
        bt = 1
        while (bt * 2 <= B and B % (bt * 2) == 0
               and 2 * bt * CB * HW * itemsize <= 2 * 1024 * 1024
               and (B // (bt * 2)) * n_cb >= 2):
            bt *= 2
        batch_block = bt
    BT = batch_block
    n_b = pl.cdiv(B, BT)

    # v7x has 2 TensorCores: if the grid collapsed to one step, split channels
    # (only when the halved block stays a multiple of 8 sublanes).
    if n_b * n_cb < 2 and CB % 16 == 0:
        CB //= 2
        n_cb = pl.cdiv(C, CB)

    # ---- layout plumbing (free reshapes on contiguous arrays) ---------------
    x_flat = x_nchw.reshape(B, C, HW)        # lane-dense spatial axis
    w2 = weight_oihw.reshape(C, 9)           # (C,1,3,3) -> (C,9), tap-major last
    b2 = bias.reshape(C, 1)

    # ---- VMEM budget: double-buffered in/out blocks + resident tile + f32
    #      accumulator / tap temporaries, 2x headroom, capped for v7x (64 MiB/TC)
    blk = BT * CB * HW
    est = 4 * blk * itemsize + blk * itemsize + 3 * blk * 4 + 64 * 1024
    vmem_limit = int(min(40 * 1024 * 1024, max(16 * 1024 * 1024, 2 * est)))

    out = pl.pallas_call(
        functools.partial(peg_kernel, H=H, W=W),
        out_shape=jax.ShapeDtypeStruct((B, C, HW), x_nchw.dtype),
        grid=(n_b, n_cb),
        in_specs=[
            pl.BlockSpec((BT, CB, HW), lambda bi, ci: (bi, ci, 0)),   # x
            pl.BlockSpec((CB, 9), lambda bi, ci: (ci, 0)),            # weights
            pl.BlockSpec((CB, 1), lambda bi, ci: (ci, 0)),            # bias
        ],
        out_specs=pl.BlockSpec((BT, CB, HW), lambda bi, ci: (bi, ci, 0)),
        compiler_params=pltpu.CompilerParams(
            dimension_semantics=("parallel", "parallel"),
            vmem_limit_bytes=vmem_limit,
        ),
    )(x_flat, w2, b2)

    return out.reshape(B, C, H, W)


def peg_reference(x_nchw, weight_oihw, bias):
    """Plain-JAX reference (depthwise conv + bias + residual)."""
    C = x_nchw.shape[1]
    y = jax.lax.conv_general_dilated(
        x_nchw, weight_oihw,
        window_strides=(1, 1),
        padding=((1, 1), (1, 1)),
        dimension_numbers=("NCHW", "OIHW", "NCHW"),
        feature_group_count=C,
    )
    return y + bias[None, :, None, None] + x_nchw


if __name__ == "__main__":
    key = jax.random.PRNGKey(0)
    kx, kw, kb = jax.random.split(key, 3)

    B, C, H, W = 2, 4, 16, 16
    x = jax.random.normal(kx, (B, C, H, W), dtype=jnp.float32)
    # deterministic synthetic parameters (nn.Conv2d(dim, dim, 3, groups=dim))
    weight = jax.random.normal(kw, (C, 1, 3, 3), dtype=jnp.float32) * 0.1
    bias = jax.random.normal(kb, (C,), dtype=jnp.float32) * 0.1

    ref = peg_reference(x, weight, bias)

    out = peg_forward(x, weight, bias)
    out = jax.block_until_ready(out)

    assert out.shape == ref.shape == (B, C, H, W)
    assert jnp.allclose(out, ref, atol=1e-5, rtol=1e-5), "mismatch vs reference"

    print("KERNEL_OK")
</pallas_src>

<mosaic_0001>
module attributes {stable_mosaic.version = 11 : i64} {
  func.func @peg_kernel(%arg0: i32, %arg1: i32, %arg2: memref<1x4x256xf32, #tpu.memory_space<vmem>>, %arg3: memref<4x9xf32, #tpu.memory_space<vmem>>, %arg4: memref<4x1xf32, #tpu.memory_space<vmem>>, %arg5: memref<1x4x256xf32, #tpu.memory_space<vmem>>) attributes {dimension_semantics = [#tpu.dimension_semantics<parallel>, #tpu.dimension_semantics<parallel>], iteration_bounds = array<i64: 2, 1>, scalar_prefetch = 0 : i64, scratch_operands = 0 : i64, tpu.core_type = #tpu.core_type<tc>, window_params = [{transform_indices = @transform_0, window_bounds = array<i64: 1, 4, 256>}, {transform_indices = @transform_1, window_bounds = array<i64: 4, 9>}, {transform_indices = @transform_2, window_bounds = array<i64: 4, 1>}, {transform_indices = @transform_3, window_bounds = array<i64: 1, 4, 256>}]} {
    %c0 = arith.constant 0 : index
    %c0_0 = arith.constant 0 : index
    %c0_1 = arith.constant 0 : index
    %0 = vector.load %arg2[%c0, %c0_0, %c0_1] : memref<1x4x256xf32, #tpu.memory_space<vmem>>, vector<1x4x256xf32>
    %c0_2 = arith.constant 0 : index
    %c0_3 = arith.constant 0 : index
    %1 = vector.load %arg3[%c0_2, %c0_3] : memref<4x9xf32, #tpu.memory_space<vmem>>, vector<4x9xf32>
    %c0_4 = arith.constant 0 : index
    %c0_5 = arith.constant 0 : index
    %2 = vector.load %arg4[%c0_4, %c0_5] : memref<4x1xf32, #tpu.memory_space<vmem>>, vector<4x1xf32>
    %3 = tpu.iota {dimensions = array<i32: 2>} : vector<1x1x256xi32>
    %c16_i32 = arith.constant 16 : i32
    %c0_i32 = arith.constant 0 : i32
    %4 = arith.cmpi eq, %c16_i32, %c0_i32 : i32
    %c1_i32 = arith.constant 1 : i32
    %5 = arith.select %4, %c1_i32, %c16_i32 : i32
    %6 = vector.broadcast %5 : i32 to vector<1x1x256xi32>
    %7 = arith.remsi %3, %6 : vector<1x1x256xi32>
    %c0_i32_6 = arith.constant 0 : i32
    %8 = vector.broadcast %c0_i32_6 : i32 to vector<1x1x256xi32>
    %9 = arith.cmpi ne, %7, %8 : vector<1x1x256xi32>
    %c0_i32_7 = arith.constant 0 : i32
    %10 = vector.broadcast %c0_i32_7 : i32 to vector<1x1x256xi32>
    %11 = arith.cmpi slt, %7, %10 : vector<1x1x256xi32>
    %c0_i32_8 = arith.constant 0 : i32
    %12 = arith.cmpi slt, %5, %c0_i32_8 : i32
    %13 = vector.broadcast %12 : i1 to vector<1x1x256xi1>
    %14 = vector.broadcast %13 : vector<1x1x256xi1> to vector<1x1x256xi1>
    %15 = arith.xori %11, %14 : vector<1x1x256xi1>
    %16 = arith.andi %15, %9 : vector<1x1x256xi1>
    %17 = vector.broadcast %5 : i32 to vector<1x1x256xi32>
    %18 = arith.addi %7, %17 : vector<1x1x256xi32>
    %19 = arith.select %16, %18, %7 : vector<1x1x256xi1>, vector<1x1x256xi32>
    %c0_i32_9 = arith.constant 0 : i32
    %20 = vector.broadcast %c0_i32_9 : i32 to vector<1x1x256xi32>
    %21 = arith.cmpi sgt, %19, %20 : vector<1x1x256xi32>
    %c15_i32 = arith.constant 15 : i32
    %22 = vector.broadcast %c15_i32 : i32 to vector<1x1x256xi32>
    %23 = arith.cmpi slt, %19, %22 : vector<1x1x256xi32>
    %c16_i32_10 = arith.constant 16 : i32
    %24 = vector.broadcast %c16_i32_10 : i32 to vector<1x1x256xi32>
    %25 = arith.cmpi sge, %3, %24 : vector<1x1x256xi32>
    %c240_i32 = arith.constant 240 : i32
    %26 = vector.broadcast %c240_i32 : i32 to vector<1x1x256xi32>
    %27 = arith.cmpi slt, %3, %26 : vector<1x1x256xi32>
    %28 = vector.shape_cast %2 : vector<4x1xf32> to vector<1x4x1xf32>
    %29 = vector.broadcast %28 : vector<1x4x1xf32> to vector<1x4x256xf32>
    %30 = arith.addf %0, %29 : vector<1x4x256xf32>
    %c17_i32 = arith.constant 17 : i32
    %31 = tpu.dynamic_rotate %0 by %c17_i32 dim 2 : vector<1x4x256xf32>, i32 -> vector<1x4x256xf32>
    %32 = arith.andi %21, %25 : vector<1x1x256xi1>
    %cst = arith.constant 0.000000e+00 : f32
    %33 = vector.shape_cast %32 : vector<1x1x256xi1> to vector<1x1x256xi1>
    %34 = vector.broadcast %33 : vector<1x1x256xi1> to vector<1x4x256xi1>
    %35 = vector.broadcast %cst : f32 to vector<1x4x256xf32>
    %36 = arith.select %34, %31, %35 : vector<1x4x256xi1>, vector<1x4x256xf32>
    %37 = vector.extract_strided_slice %1 {offsets = [0, 0], sizes = [4, 1], strides = [1, 1]} : vector<4x9xf32> to vector<4x1xf32>
    %38 = vector.shape_cast %37 : vector<4x1xf32> to vector<1x4x1xf32>
    %39 = vector.broadcast %38 : vector<1x4x1xf32> to vector<1x4x256xf32>
    %40 = arith.mulf %36, %39 : vector<1x4x256xf32>
    %41 = arith.addf %30, %40 : vector<1x4x256xf32>
    %c16_i32_11 = arith.constant 16 : i32
    %42 = tpu.dynamic_rotate %0 by %c16_i32_11 dim 2 : vector<1x4x256xf32>, i32 -> vector<1x4x256xf32>
    %cst_12 = arith.constant 0.000000e+00 : f32
    %43 = vector.shape_cast %25 : vector<1x1x256xi1> to vector<1x1x256xi1>
    %44 = vector.broadcast %43 : vector<1x1x256xi1> to vector<1x4x256xi1>
    %45 = vector.broadcast %cst_12 : f32 to vector<1x4x256xf32>
    %46 = arith.select %44, %42, %45 : vector<1x4x256xi1>, vector<1x4x256xf32>
    %47 = vector.extract_strided_slice %1 {offsets = [0, 1], sizes = [4, 1], strides = [1, 1]} : vector<4x9xf32> to vector<4x1xf32>
    %48 = vector.shape_cast %47 : vector<4x1xf32> to vector<1x4x1xf32>
    %49 = vector.broadcast %48 : vector<1x4x1xf32> to vector<1x4x256xf32>
    %50 = arith.mulf %46, %49 : vector<1x4x256xf32>
    %51 = arith.addf %41, %50 : vector<1x4x256xf32>
    %c15_i32_13 = arith.constant 15 : i32
    %52 = tpu.dynamic_rotate %0 by %c15_i32_13 dim 2 : vector<1x4x256xf32>, i32 -> vector<1x4x256xf32>
    %53 = arith.andi %23, %25 : vector<1x1x256xi1>
    %cst_14 = arith.constant 0.000000e+00 : f32
    %54 = vector.shape_cast %53 : vector<1x1x256xi1> to vector<1x1x256xi1>
    %55 = vector.broadcast %54 : vector<1x1x256xi1> to vector<1x4x256xi1>
    %56 = vector.broadcast %cst_14 : f32 to vector<1x4x256xf32>
    %57 = arith.select %55, %52, %56 : vector<1x4x256xi1>, vector<1x4x256xf32>
    %58 = vector.extract_strided_slice %1 {offsets = [0, 2], sizes = [4, 1], strides = [1, 1]} : vector<4x9xf32> to vector<4x1xf32>
    %59 = vector.shape_cast %58 : vector<4x1xf32> to vector<1x4x1xf32>
    %60 = vector.broadcast %59 : vector<1x4x1xf32> to vector<1x4x256xf32>
    %61 = arith.mulf %57, %60 : vector<1x4x256xf32>
    %62 = arith.addf %51, %61 : vector<1x4x256xf32>
    %c1_i32_15 = arith.constant 1 : i32
    %63 = tpu.dynamic_rotate %0 by %c1_i32_15 dim 2 : vector<1x4x256xf32>, i32 -> vector<1x4x256xf32>
    %cst_16 = arith.constant 0.000000e+00 : f32
    %64 = vector.shape_cast %21 : vector<1x1x256xi1> to vector<1x1x256xi1>
    %65 = vector.broadcast %64 : vector<1x1x256xi1> to vector<1x4x256xi1>
    %66 = vector.broadcast %cst_16 : f32 to vector<1x4x256xf32>
    %67 = arith.select %65, %63, %66 : vector<1x4x256xi1>, vector<1x4x256xf32>
    %68 = vector.extract_strided_slice %1 {offsets = [0, 3], sizes = [4, 1], strides = [1, 1]} : vector<4x9xf32> to vector<4x1xf32>
    %69 = vector.shape_cast %68 : vector<4x1xf32> to vector<1x4x1xf32>
    %70 = vector.broadcast %69 : vector<1x4x1xf32> to vector<1x4x256xf32>
    %71 = arith.mulf %67, %70 : vector<1x4x256xf32>
    %72 = arith.addf %62, %71 : vector<1x4x256xf32>
    %73 = vector.extract_strided_slice %1 {offsets = [0, 4], sizes = [4, 1], strides = [1, 1]} : vector<4x9xf32> to vector<4x1xf32>
    %74 = vector.shape_cast %73 : vector<4x1xf32> to vector<1x4x1xf32>
    %75 = vector.broadcast %74 : vector<1x4x1xf32> to vector<1x4x256xf32>
    %76 = arith.mulf %0, %75 : vector<1x4x256xf32>
    %77 = arith.addf %72, %76 : vector<1x4x256xf32>
    %c255_i32 = arith.constant 255 : i32
    %78 = tpu.dynamic_rotate %0 by %c255_i32 dim 2 : vector<1x4x256xf32>, i32 -> vector<1x4x256xf32>
    %cst_17 = arith.constant 0.000000e+00 : f32
    %79 = vector.shape_cast %23 : vector<1x1x256xi1> to vector<1x1x256xi1>
    %80 = vector.broadcast %79 : vector<1x1x256xi1> to vector<1x4x256xi1>
    %81 = vector.broadcast %cst_17 : f32 to vector<1x4x256xf32>
    %82 = arith.select %80, %78, %81 : vector<1x4x256xi1>, vector<1x4x256xf32>
    %83 = vector.extract_strided_slice %1 {offsets = [0, 5], sizes = [4, 1], strides = [1, 1]} : vector<4x9xf32> to vector<4x1xf32>
    %84 = vector.shape_cast %83 : vector<4x1xf32> to vector<1x4x1xf32>
    %85 = vector.broadcast %84 : vector<1x4x1xf32> to vector<1x4x256xf32>
    %86 = arith.mulf %82, %85 : vector<1x4x256xf32>
    %87 = arith.addf %77, %86 : vector<1x4x256xf32>
    %c241_i32 = arith.constant 241 : i32
    %88 = tpu.dynamic_rotate %0 by %c241_i32 dim 2 : vector<1x4x256xf32>, i32 -> vector<1x4x256xf32>
    %89 = arith.andi %21, %27 : vector<1x1x256xi1>
    %cst_18 = arith.constant 0.000000e+00 : f32
    %90 = vector.shape_cast %89 : vector<1x1x256xi1> to vector<1x1x256xi1>
    %91 = vector.broadcast %90 : vector<1x1x256xi1> to vector<1x4x256xi1>
    %92 = vector.broadcast %cst_18 : f32 to vector<1x4x256xf32>
    %93 = arith.select %91, %88, %92 : vector<1x4x256xi1>, vector<1x4x256xf32>
    %94 = vector.extract_strided_slice %1 {offsets = [0, 6], sizes = [4, 1], strides = [1, 1]} : vector<4x9xf32> to vector<4x1xf32>
    %95 = vector.shape_cast %94 : vector<4x1xf32> to vector<1x4x1xf32>
    %96 = vector.broadcast %95 : vector<1x4x1xf32> to vector<1x4x256xf32>
    %97 = arith.mulf %93, %96 : vector<1x4x256xf32>
    %98 = arith.addf %87, %97 : vector<1x4x256xf32>
    %c240_i32_19 = arith.constant 240 : i32
    %99 = tpu.dynamic_rotate %0 by %c240_i32_19 dim 2 : vector<1x4x256xf32>, i32 -> vector<1x4x256xf32>
    %cst_20 = arith.constant 0.000000e+00 : f32
    %100 = vector.shape_cast %27 : vector<1x1x256xi1> to vector<1x1x256xi1>
    %101 = vector.broadcast %100 : vector<1x1x256xi1> to vector<1x4x256xi1>
    %102 = vector.broadcast %cst_20 : f32 to vector<1x4x256xf32>
    %103 = arith.select %101, %99, %102 : vector<1x4x256xi1>, vector<1x4x256xf32>
    %104 = vector.extract_strided_slice %1 {offsets = [0, 7], sizes = [4, 1], strides = [1, 1]} : vector<4x9xf32> to vector<4x1xf32>
    %105 = vector.shape_cast %104 : vector<4x1xf32> to vector<1x4x1xf32>
    %106 = vector.broadcast %105 : vector<1x4x1xf32> to vector<1x4x256xf32>
    %107 = arith.mulf %103, %106 : vector<1x4x256xf32>
    %108 = arith.addf %98, %107 : vector<1x4x256xf32>
    %c239_i32 = arith.constant 239 : i32
    %109 = tpu.dynamic_rotate %0 by %c239_i32 dim 2 : vector<1x4x256xf32>, i32 -> vector<1x4x256xf32>
    %110 = arith.andi %23, %27 : vector<1x1x256xi1>
    %cst_21 = arith.constant 0.000000e+00 : f32
    %111 = vector.shape_cast %110 : vector<1x1x256xi1> to vector<1x1x256xi1>
    %112 = vector.broadcast %111 : vector<1x1x256xi1> to vector<1x4x256xi1>
    %113 = vector.broadcast %cst_21 : f32 to vector<1x4x256xf32>
    %114 = arith.select %112, %109, %113 : vector<1x4x256xi1>, vector<1x4x256xf32>
    %115 = vector.extract_strided_slice %1 {offsets = [0, 8], sizes = [4, 1], strides = [1, 1]} : vector<4x9xf32> to vector<4x1xf32>
    %116 = vector.shape_cast %115 : vector<4x1xf32> to vector<1x4x1xf32>
    %117 = vector.broadcast %116 : vector<1x4x1xf32> to vector<1x4x256xf32>
    %118 = arith.mulf %114, %117 : vector<1x4x256xf32>
    %119 = arith.addf %108, %118 : vector<1x4x256xf32>
    %c0_22 = arith.constant 0 : index
    %c0_23 = arith.constant 0 : index
    %c0_24 = arith.constant 0 : index
    %120 = vector.load %arg5[%c0_22, %c0_23, %c0_24] : memref<1x4x256xf32, #tpu.memory_space<vmem>>, vector<1x4x256xf32>
    tpu.vector_store %arg5[%c0_22, %c0_23, %c0_24], %119 {strides = array<i32>} : memref<1x4x256xf32, #tpu.memory_space<vmem>>, vector<1x4x256xf32>,
    return
  }
  func.func @transform_0(%arg0: i32, %arg1: i32) -> (i32, i32, i32) {
    %c0_i32 = arith.constant 0 : i32
    %c0_i32_0 = arith.constant 0 : i32
    return %arg0, %arg1, %c0_i32 : i32, i32, i32
  }
  func.func @transform_1(%arg0: i32, %arg1: i32) -> (i32, i32) {
    %c0_i32 = arith.constant 0 : i32
    %c0_i32_0 = arith.constant 0 : i32
    return %arg1, %c0_i32 : i32, i32
  }
  func.func @transform_2(%arg0: i32, %arg1: i32) -> (i32, i32) {
    %c0_i32 = arith.constant 0 : i32
    %c0_i32_0 = arith.constant 0 : i32
    return %arg1, %c0_i32 : i32, i32
  }
  func.func @transform_3(%arg0: i32, %arg1: i32) -> (i32, i32, i32) {
    %c0_i32 = arith.constant 0 : i32
    %c0_i32_0 = arith.constant 0 : i32
    return %arg0, %arg1, %c0_i32 : i32, i32, i32
  }
}

</mosaic_0001>

<bundles_post_ra>
// kernel: tpu_custom_call.1
= control target key start
LH: loop header
LB: loop body
LE: loop exit
PB: predicated region body
PF: predicated region fallthrough
CT: control target
= control target key end

     0   :  { %8 = vsyncpa [#allocation3], 0  ;;  %s1191_s0 = inlined_call_operand.hbm [shape: f32[2,4,256], index: 0, kind: input, shape index: {}]   ;;  %s1192_s1 = inlined_call_operand.vmem [shape: f32[4,9], index: 1, kind: input, shape index: {}]   ;;  %s1193_s2 = inlined_call_operand.vmem [shape: f32[4,1], index: 2, kind: input, shape index: {}]   ;;  %s1194_s3 = inlined_call_operand.hbm [shape: f32[2,4,256], index: 3, kind: output, shape index: {}]  }
   0x1   :  { %10 = vsyncpa [#allocation3 + $0x1], 0 }
   0x2   :  { %11 = vsyncpa [#allocation4], 0 }
   0x3   :  { %13 = vsyncpa [#allocation4 + $0x1], 0  ;;  %s903_s12 = smov 0   ;;  %s905_s13 = smov 0  }
   0x4   :  { %s907_s14 = smov 0   ;;  %s909_s15 = smov 0  }
   0x5   :  { %s911_s16 = smov 0   ;;  %s913_s17 = smov 0  }
   0x6 LB: > { %s639_s18 = sadd.s32 4294967295, %s861_s17   ;;  %s640_s19 = sadd.s32 4294967294, %s861_s17   ;;  %s861_s17 = sphi %s913_s17, %s19_s17   ;;  %s857_s16 = sphi %s911_s16, %s1222_s16   ;;  %s853_s15 = sphi %s909_s15, %s1221_s15   ;;  %s849_s14 = sphi %s907_s14, %s1220_s14   ;;  %s845_s13 = sphi %s905_s13, %s1219_s13   ;;  %s841_s12 = sphi %s903_s12, %s1218_s12  }
   0x7   : > { %s31_s20 = sadd.s32 1, %s857_s16  ;;  %s40_s21 = sadd.s32 1, %s849_s14 }
   0x8   : > { %p33_p0 = scmp.ge.s32.totalorder %s31_s20, 2  ;;  %p47_p1 = scmp.ne.s32.totalorder %s849_s14, %s845_s13 }
   0x9   : > { %p48_p2 = scmp.eq.s32.totalorder %s861_s17, 0  ;;  %p53_p3 = scmp.ne.s32.totalorder %s845_s13, %s841_s12 }
   0xa   : > { %s1224_s20 = smov (%p33_p0, %s31_s20), 0  ;;  %p54_p5 = scmp.eq.s32.totalorder %s639_s18, 0 }
   0xb   : > { %p944_p4 = por %p48_p2, %p47_p1  ;;  %s35_s23 = ssub.s32 %s857_s16, %s1224_s20 }
   0xc   : > { %p131_p6 = scmp.eq.s32.totalorder %s639_s18, 1  ;;  %p38_p7 = scmp.eq.s32.totalorder %s35_s23, 0 }
   0xd   : > { %p950_p8 = por %p54_p5, %p53_p3  ;;  %p137_p10 = scmp.eq.s32.totalorder %s640_s19, 1 }
   0xe   : > { %p954_p9 = por %p131_p6, %p47_p1  ;;  %p670_p13 = scmp.lt.s32.totalorder %s861_s17, 2 }
   0xf   : > { %s959_s26 = scalar_select %p38_p7, %s849_s14, %s40_s21  }
  0x10   : > { %s1198_s25 = scalar_select %p954_p9, 1, 0 }
  0x11   : > { %p961_p11 = por %p137_p10, %p53_p3  ;;  %s171_s28 = sand.u32 1, %s849_s14  }
  0x12   : > { %s645_s29 = sshll.u32 %s171_s28, 3  ;;  %s656_s30 = sshll.u32 %s857_s16, 7 }
  0x13   : > { %s1199_s27 = scalar_select %p961_p11, 1, 0 }
  0x14   : > { %s972_s6 = scalar_lea.hbm %s1191_s0, %s656_s30  ;;  %s175_s7 = scalar_lea.vmem [#allocation2], %s645_s29 }
  0x15   : > { %s185_s8 = sshll.u32 %s175_s7, 4  ;;  %p978_p0 = pnand %p670_p13, %p944_p4  ;;  %s974_s8 = int_to_ptr.vmem [resolvable:$true] %s185_s8 }
  0x16   : > { %s172_s10 = scalar_lea.sflag [#allocation3], %s171_s28  ;;  %s749_s11 = scalar_lea.hbm %s972_s6, 128 }
  0x17   : > { %p750_p3 = scmp.ne.s32.totalorder %s972_s6, %s749_s11  ;;  %p751_p5 = pneg %p978_p0 }
  0x18   : > { %s754_s21 = scalar_lea.hbm %s1191_s0, 256  ;;  %p755_p4 = scmp.lt.u32.totalorder %s972_s6, %s1191_s0 }
  0x19   : > { %p752_p6 = pnand %p751_p5, %p750_p3  ;;  %p756_p10 = scmp.lt.u32.totalorder %s754_s21, %s749_s11 }
  0x1a   : > { %p758_p12 = scmp.lt.u32.totalorder %s749_s11, %s972_s6 }
  0x1b   : > { %p753_p7 = pneg %p752_p6  ;;  %p757_p13 = por %p756_p10, %p755_p4 }
  0x1d   : > { %p759_p1 = por %p758_p12, %p757_p13 }
  0x1f   : > { %p760_p2 = pnand %p759_p1, %p753_p7 }
  0x21   : > { %763 = shalt.err (!%p760_p2)
}
  0x22   : > { %s764_s28 = scalar_lea.vmem %s974_s8, 128  ;;  %s863_s29 = smov [#allocation2]  }
  0x23   : > { %p765_p3 = scmp.ne.s32.totalorder %s974_s8, %s764_s28  ;;  %s769_s30 = sshll.u32 %s863_s29, 4  ;;  %s770_s30 = int_to_ptr.vmem [resolvable:$false] %s769_s30 }
  0x24   : > { %s771_s4 = scalar_lea.vmem %s770_s30, 256  ;;  %p772_p9 = scmp.lt.s32.totalorder %s974_s8, %s770_s30 }
  0x25   : > { %p767_p6 = pnand %p765_p3, %p751_p5  ;;  %p773_p4 = scmp.lt.s32.totalorder %s771_s4, %s764_s28 }
  0x27   : > { %p768_p11 = pneg %p767_p6  ;;  %p774_p10 = por %p773_p4, %p772_p9 }
  0x29   : > { %p775_p12 = pnand %p774_p10, %p768_p11 }
  0x2b   : > { %778 = shalt.err (!%p775_p12)
}
  0x2c   : > { %665 = dma.hbm_to_vmem [thread:$0]  (!%p978_p0), %s972_s6, 128, %s974_s8, %s172_s10  }
  0x2d   : > { %p1201_p1 = scmp.lt.s32.totalorder %s861_s17, 3  ;;  %p1202_p2 = scmp.ge.s32.totalorder %s861_s17, 1 }
  0x2f   : > { %p191_p5 = pnand %p1202_p2, %p1201_p1 }
  0x30   : > { %s1014_s5 = sand.u32 (!%p191_p5), 1, %s845_s13  }
  0x31   : > { %194 = sbr.rel (%p191_p5) target bundleno = 266 (0x10a), region = 32  ;;  %s649_s7 = sshll.u32 (!%p191_p5), %s1014_s5, 3 }
  0x32   : > { %s197_s11 = scalar_lea.sflag (!%p191_p5), [#allocation3], %s1014_s5  ;;  %s200_s9 = scalar_lea.vmem (!%p191_p5), [#allocation2], %s649_s7 }
  0x38   : > { %832 = dma.done.wait (%p950_p8), %s197_s11, 128  }
  0x39   : > { %834 = vsyncadd (%p950_p8), %s197_s11, 4294967168  ;;  %v864_v0 = vmov 1   ;;  %v865_v1 = vmov 0   ;;  %v240_v2 = vld [vmem:[%s1192_s1] sm:$0xf]  ;;  %v866_v5 = vmov 2   ;;  %v242_v20 = vlaneseq }
  0x3a   : > { %739 = vset.pattern.permute.xlu1 %v864_v0  ;;  %738 = vset.pattern.permute.xlu0 %v865_v1  ;;  %v241_v3 = vld [vmem:[%s1193_s2] sm:$0xf]  ;;  %s867_s24 = smov 17   ;;  %v868_v7 = vmov 3   ;;  %v869_v8 = vmov 7   ;;  %s870_s19 = smov 16  }
  0x3b   : > { %334 = vperm.xlu1 %739, %v240_v2   ;;  %279 = vperm.xlu0 %738, %v241_v3   ;;  %v1030_v4 = vld [vmem:[%s200_s9] sm:$0xff]  ;;  %v871_v9 = vmov 4   ;;  %s872_s21 = smov 15   ;;  %v873_v10 = vmov 5   ;;  %v874_v11 = vmov 6   ;;  %s875_s22 = smov 1  }
  0x3c   : > { %v291_v6 = vcombine.high %v1030_v4, %v1030_v4  ;;  %s876_s23 = smov 127   ;;  %v877_v12 = vmov 8   ;;  %s878_s28 = smov 113   ;;  %v1042_v23 = vand.u32 127, %v242_v20  ;;  %v881_v27 = vmov 839922192  }
  0x3d   : > { %s879_s29 = smov 112   ;;  %s880_s30 = smov 111   ;;  %v282_v28 = vunpack.c.l.s4 %v881_v27  ;;  %v285_v31 = vshrl.u32 %v242_v20, 7 }
  0x3e   : > { %v1047_v26 = vadd.s32 128, %v1042_v23  ;;  %v249_v29 = vand.u32 15, %v1042_v23  ;;  %vm273_vm1 = vcmp.ge.s32.totalorder %v1042_v23, 16  ;;  %vm297_vm2 = vcmp.lt.s32.totalorder %v1042_v23, 17  ;;  %s657_s4 = sshll.u32 %s853_s15, 7  ;;  %s230_s11 = scalar_lea.vmem [#allocation5], %s649_s7 }
  0x3f   : > { %740 = vset.pattern.permute.xlu1 %v866_v5  ;;  %310 = vperm.xlu0 %738, %v240_v2   ;;  %v283_v33 = vunpack.c.0.s8 %v282_v28  ;;  %vm324_vm5 = vcmp.lt.s32.totalorder %v1042_v23, 16  ;;  %vm348_vm7 = vcmp.lt.s32.totalorder %v1042_v23, 15  ;;  %vm374_vm10 = vcmp.lt.s32.totalorder %v1042_v23, 1  ;;  %s525_s9 = sshll.u32 %s230_s11, 4  ;;  %s1142_s10 = scalar_lea.hbm %s1194_s3, %s657_s4  ;;  %s1144_s9 = int_to_ptr.vmem [resolvable:$true] %s525_s9 }
  0x40   : > { %360 = vperm.xlu1 %740, %v240_v2   ;;  %v256_v32 = vand.u32 15, %v1047_v26  ;;  %vm1051_vm0 = vcmp.gt.s32.totalorder %v249_v29, 0  ;;  %vm1072_vm6 = vcmp.lt.s32.totalorder %v249_v29, 15  ;;  %vm411_vm11 = vcmp.lt.s32.totalorder %v1042_v23, 127  ;;  %s509_s18 = scalar_lea.sflag [#allocation4], %s1014_s5  ;;  %p1215_p9 = scmp.ne.s32.totalorder %s1198_s25, 0 }
  0x41   : > { %vm1065_vm4 = vmand %vm1051_vm0, %vm273_vm1  ;;  %v1070_v41 = vsub.s32 %v283_v33, %v285_v31  ;;  %vm276_vm12 = vcmp.lt.s32.totalorder %v1047_v26, 240  ;;  %vm435_vm13 = vcmp.lt.s32.totalorder %v1042_v23, 113  ;;  %vm461_vm15 = vcmp.lt.s32.totalorder %v1042_v23, 112  ;;  %s882_s15 = smov [#allocation5]  }
  0x42   : > { %vm1057_vm3 = vcmp.gt.s32.totalorder %v256_v32, 0  ;;  %vm1083_vm8 = vcmp.lt.s32.totalorder %v256_v32, 15  ;;  %vm1092_vm9 = vmand %vm1072_vm6, %vm273_vm1  ;;  %s783_s7 = sshll.u32 %s882_s15, 4  ;;  %s784_s7 = int_to_ptr.vmem [resolvable:$false] %s783_s7 }
  0x43   : > { %293 = vrot.lane.b32.xlu0 %v1030_v4, %s867_s24  ;;  %vm439_vm14 = vmand %vm1057_vm3, %vm276_vm12  ;;  %p786_p7 = scmp.lt.s32.totalorder %s1144_s9, %s784_s7 }
  0x44   : > { %295 = vrot.lane.b32.xlu1 %v291_v6, %s867_s24  ;;  %741 = vset.pattern.permute.xlu0 %v868_v7  ;;  %s779_s24 = scalar_lea.vmem %s1144_s9, 128 }
  0x45   : > { %745 = vset.pattern.permute.xlu1 %v869_v8  ;;  %p780_p8 = scmp.ne.s32.totalorder %s1144_s9, %s779_s24 }
  0x47   : > { %384 = vperm.xlu0 %741, %v240_v2   ;;  %p781_p11 = pnand %p780_p8, %p1215_p9 }
  0x48   : > { %320 = vrot.lane.b32.xlu1 %v1030_v4, %s870_s19 }
  0x49   : > { %p782_p0 = pneg %p781_p11 }
  0x4b   : > { %742 = vset.pattern.permute.xlu0 %v871_v9 }
  0x4c   : > { %322 = vrot.lane.b32.xlu1 %v291_v6, %s870_s19  ;;  %395 = vperm.xlu0 %742, %v240_v2   ;;  %s785_s19 = scalar_lea.vmem %s784_s7, 256 }
  0x4d   : > { %p787_p13 = scmp.lt.s32.totalorder %s785_s19, %s779_s24 }
  0x4f   : > { %p788_p3 = por %p787_p13, %p786_p7 }
  0x50   : > { %344 = vrot.lane.b32.xlu1 %v1030_v4, %s872_s21  ;;  %743 = vset.pattern.permute.xlu0 %v873_v10 }
  0x51   : > { %421 = vperm.xlu0 %743, %v240_v2   ;;  %p789_p6 = pnand %p788_p3, %p782_p0 }
  0x54   : > { %346 = vrot.lane.b32.xlu1 %v291_v6, %s872_s21 }
  0x55   : > { %744 = vset.pattern.permute.xlu0 %v874_v11 }
  0x56   : > { %447 = vperm.xlu0 %744, %v240_v2  }
  0x58   : > { %370 = vrot.lane.b32.xlu1 %v1030_v4, %s875_s22 }
  0x5a   : > { %409 = vrot.lane.b32.xlu0 %v291_v6, %s876_s23 }
  0x5b   : > { %747 = vset.pattern.permute.xlu0 %v877_v12 }
  0x5c   : > { %372 = vrot.lane.b32.xlu1 %v291_v6, %s875_s22 }
  0x5e   : > { %431 = vrot.lane.b32.xlu0 %v1030_v4, %s878_s28 }
  0x60   : > { %471 = vperm.xlu1 %745, %v240_v2  }
  0x62   : > { %457 = vrot.lane.b32.xlu0 %v1030_v4, %s879_s29 }
  0x64   : > { %407 = vrot.lane.b32.xlu1 %v1030_v4, %s876_s23 }
  0x65   : > { %746 = vset.pattern.permute.xlu1 %v877_v12 }
  0x66   : > { %481 = vrot.lane.b32.xlu0 %v1030_v4, %s880_s30 }
  0x68   : > { %497 = vperm.xlu1 %746, %v240_v2  }
  0x6c   : > { %433 = vrot.lane.b32.xlu1 %v291_v6, %s878_s28 }
  0x70   : > { %459 = vrot.lane.b32.xlu1 %v291_v6, %s879_s29 }
  0x74   : > { %483 = vrot.lane.b32.xlu1 %v291_v6, %s880_s30 }
  0xba   : > { %v335_v13 = vpop.permute.xlu1 %334  ;;  %v280_v14 = vpop.permute.xlu0 %279 }
  0xbb   : > { %v287_v49 = vrot.slane %v280_v14, %v1070_v41 }
  0xbd   : > { %v289_v1 = vadd.f32 %v287_v49, %v1030_v4 }
  0xbe   : > { %v311_v16 = vpop.permute.xlu0 %310 }
  0xbf   : > { %v361_v15 = vpop.permute.xlu1 %360 }
  0xc2   : > { %v294_v18 = vpop.permute.xlu0 %293 }
  0xc3   : > { %v296_v17 = vpop.permute.xlu1 %295 }
  0xc4   : > { %v298_v39 = vsel %vm297_vm2, %v294_v18, %v296_v17  ;;  %v299_v40 = vsel %vm297_vm2, %v296_v17, %v294_v18 }
  0xc5   : > { %v306_v43 = vsel %vm1065_vm4, %v299_v40, 0.0  ;;  %v307_v44 = vsel %vm1057_vm3, %v298_v39, 0.0 }
  0xc6   : > { %v385_v21 = vpop.permute.xlu0 %384  ;;  %v313_v53 = vmul.f32 %v311_v16, %v306_v43  ;;  %v314_v54 = vmul.f32 %v311_v16, %v307_v44 }
  0xc7   : > { %v321_v19 = vpop.permute.xlu1 %320 }
  0xc8   : > { %v317_v2 = vcombine.low %v313_v53, %v314_v54 }
  0xca   : > { %v319_v16 = vadd.f32 %v317_v2, %v289_v1 }
  0xcb   : > { %v323_v22 = vpop.permute.xlu1 %322  ;;  %v1044_v25 = vpop.permute.xlu0 %395 }
  0xcc   : > { %v326_v45 = vsel %vm324_vm5, %v323_v22, %v321_v19  ;;  %v325_v55 = vsel %vm324_vm5, %v321_v19, %v323_v22 }
  0xcd   : > { %v331_v56 = vsel %vm273_vm1, %v326_v45, 0.0  ;;  %v338_v63 = vmul.f32 %v335_v13, %v325_v55  ;;  %vm489_vm1 = vmand %vm1083_vm8, %vm276_vm12 }
  0xce   : > { %v337_v62 = vmul.f32 %v335_v13, %v331_v56 }
  0xcf   : > { %v345_v24 = vpop.permute.xlu1 %344 }
  0xd0   : > { %v422_v35 = vpop.permute.xlu0 %421  ;;  %v341_v9 = vcombine.low %v337_v62, %v338_v63 }
  0xd2   : > { %v343_v19 = vadd.f32 %v341_v9, %v319_v16 }
  0xd3   : > { %v347_v30 = vpop.permute.xlu1 %346 }
  0xd4   : > { %v349_v51 = vsel %vm348_vm7, %v345_v24, %v347_v30  ;;  %v350_v52 = vsel %vm348_vm7, %v347_v30, %v345_v24  ;;  %v403_v24 = vrot.slane %v1044_v25, %v1070_v41 }
  0xd5   : > { %v448_v47 = vpop.permute.xlu0 %447  ;;  %v357_v58 = vsel %vm1092_vm9, %v350_v52, 0.0  ;;  %v358_v59 = vsel %vm1083_vm8, %v349_v51, 0.0 }
  0xd6   : > { %v363_v3 = vmul.f32 %v361_v15, %v357_v58  ;;  %v364_v5 = vmul.f32 %v361_v15, %v358_v59  ;;  %v405_v43 = vmul.f32 %v403_v24, %v1030_v4 }
  0xd7   : > { %v371_v36 = vpop.permute.xlu1 %370 }
  0xd8   : > { %v367_v17 = vcombine.low %v363_v3, %v364_v5 }
  0xd9   : > { %v410_v0 = vpop.permute.xlu0 %409 }
  0xdb   : > { %v373_v46 = vpop.permute.xlu1 %372 }
  0xdc   : > { %v375_v60 = vsel %vm374_vm10, %v371_v36, %v373_v46  ;;  %v376_v61 = vsel %vm374_vm10, %v373_v46, %v371_v36 }
  0xdd   : > { %v381_v6 = vsel %vm1051_vm0, %v376_v61, 0.0  ;;  %v382_v7 = vsel %vm1057_vm3, %v375_v60, 0.0  ;;  %v432_v10 = vpop.permute.xlu0 %431 }
  0xde   : > { %v387_v11 = vmul.f32 %v385_v21, %v381_v6  ;;  %v388_v12 = vmul.f32 %v385_v21, %v382_v7  ;;  %v369_v21 = vadd.f32 %v367_v17, %v343_v19 }
  0xdf   : > { %v472_v57 = vpop.permute.xlu1 %471 }
  0xe0   : > { %v391_v22 = vcombine.low %v387_v11, %v388_v12 }
  0xe1   : > { %v458_v28 = vpop.permute.xlu0 %457 }
  0xe2   : > { %v393_v38 = vadd.f32 %v391_v22, %v369_v21 }
  0xe3   : > { %v408_v8 = vpop.permute.xlu1 %407 }
  0xe4   : > { %v412_v13 = vsel %vm411_vm11, %v408_v8, %v410_v0  ;;  %v413_v14 = vsel %vm411_vm11, %v410_v0, %v408_v8  ;;  %v406_v34 = vadd.f32 %v405_v43, %v393_v38 }
  0xe5   : > { %v418_v15 = vsel %vm1072_vm6, %v412_v13, 0.0  ;;  %v419_v20 = vsel %vm1083_vm8, %v413_v14, 0.0  ;;  %v482_v46 = vpop.permute.xlu0 %481 }
  0xe6   : > { %v424_v29 = vmul.f32 %v422_v35, %v418_v15  ;;  %v425_v30 = vmul.f32 %v422_v35, %v419_v20 }
  0xe7   : > { %v498_v18 = vpop.permute.xlu1 %497 }
  0xe8   : > { %v428_v44 = vcombine.low %v424_v29, %v425_v30 }
  0xeb   : > { %v434_v27 = vpop.permute.xlu1 %433 }
  0xec   : > { %v436_v31 = vsel %vm435_vm13, %v432_v10, %v434_v27  ;;  %v437_v32 = vsel %vm435_vm13, %v434_v27, %v432_v10 }
  0xed   : > { %v444_v33 = vsel %vm1051_vm0, %v436_v31, 0.0  ;;  %v445_v36 = vsel %vm439_vm14, %v437_v32, 0.0  ;;  %vm485_vm0 = vcmp.lt.s32.totalorder %v1042_v23, 111 }
  0xee   : > { %v450_v39 = vmul.f32 %v448_v47, %v444_v33  ;;  %v451_v37 = vmul.f32 %v448_v47, %v445_v36  ;;  %v430_v47 = vadd.f32 %v428_v44, %v406_v34 }
  0xef   : > { %v460_v40 = vpop.permute.xlu1 %459 }
  0xf0   : > { %v462_v25 = vsel %vm461_vm15, %v458_v28, %v460_v40  ;;  %v463_v41 = vsel %vm461_vm15, %v460_v40, %v458_v28  ;;  %v454_v49 = vcombine.low %v450_v39, %v451_v37 }
  0xf1   : > { %v469_v35 = vsel %vm276_vm12, %v463_v41, 0.0  ;;  %v474_v45 = vmul.f32 %v472_v57, %v462_v25 }
  0xf2   : > { %v475_v50 = vmul.f32 %v472_v57, %v469_v35  ;;  %v456_v23 = vadd.f32 %v454_v49, %v430_v47 }
  0xf3   : > { %v484_v4 = vpop.permute.xlu1 %483 }
  0xf4   : > { %v478_v51 = vcombine.low %v474_v45, %v475_v50  ;;  %v486_v52 = vsel %vm485_vm0, %v482_v46, %v484_v4  ;;  %v487_v53 = vsel %vm485_vm0, %v484_v4, %v482_v46 }
  0xf5   : > { %v494_v54 = vsel %vm1072_vm6, %v486_v52, 0.0  ;;  %v495_v55 = vsel %vm489_vm1, %v487_v53, 0.0 }
  0xf6   : > { %v500_v56 = vmul.f32 %v498_v18, %v494_v54  ;;  %v501_v58 = vmul.f32 %v498_v18, %v495_v55  ;;  %v480_v26 = vadd.f32 %v478_v51, %v456_v23 }
  0xf8   : > { %v504_v48 = vcombine.low %v500_v56, %v501_v58 }
  0xfa   : > { %v506_v57 = vadd.f32 %v504_v48, %v480_v26 }
  0xfc   : > { %507 = vst [vmem:[%s230_s11] sm:$0xff] %v506_v57 }
  0xfd   : > { %792 = shalt.err (!%p789_p6)
}
  0xfe   : > { %s793_s5 = scalar_lea.hbm %s1142_s10, 128  ;;  %s797_s23 = scalar_lea.hbm %s1194_s3, 256 }
  0xff   : > { %p794_p4 = scmp.ne.s32.totalorder %s1142_s10, %s793_s5  ;;  %p798_p1 = scmp.lt.u32.totalorder %s1142_s10, %s1194_s3 }
 0x100   : > { %p799_p2 = scmp.lt.u32.totalorder %s797_s23, %s793_s5  ;;  %p801_p8 = scmp.lt.u32.totalorder %s793_s5, %s1142_s10 }
 0x101   : > { %p795_p10 = pnand %p794_p4, %p1215_p9 }
 0x102   : > { %p800_p5 = por %p799_p2, %p798_p1 }
 0x103   : > { %p796_p12 = pneg %p795_p10 }
 0x104   : > { %p802_p11 = por %p801_p8, %p800_p5 }
 0x106   : > { %p803_p0 = pnand %p802_p11, %p796_p12 }
 0x108   : > { %806 = shalt.err (!%p803_p0)
}
 0x109   : > { %660 = dma.vmem_to_hbm [thread:$0]  (%p1215_p9), %s1144_s9, 128, %s1142_s10, %s509_s18  }
 0x10a PF: > { %s537_s30 = sand.u32 1, %s841_s12   ;;  %p1216_p7 = scmp.ne.s32.totalorder %s1199_s27, 0 }
 0x10b   : > { %p1217_p13 = scmp.ge.s32.totalorder %s861_s17, 2  ;;  %s538_s4 = scalar_lea.sflag [#allocation4], %s537_s30 }
 0x10d   : > { %p667_p3 = pnand %p1217_p13, %p1216_p7 }
 0x10f   : > { %836 = dma.done.wait (!%p667_p3), %s538_s4, 128  }
 0x110   : > { %838 = vsyncadd (!%p667_p3), %s538_s4, 4294967168  ;;  %s19_s17 = sadd.s32 1, %s861_s17   ;;  %s1218_s12 = smov %s845_s13 }
 0x111   : > { %p16_p6 = scmp.ge.s32.totalorder %s19_s17, 4   ;;  %s1219_s13 = smov %s849_s14 }
 0x112   : > { %s1220_s14 = smov %s959_s26  ;;  %s1221_s15 = smov %s857_s16 }
 0x113   : > { %s1222_s16 = smov %s1224_s20  ;;  %18 = sbr.rel (!%p16_p6) target bundleno = 6 (0x6), region = 83 }
 0x11a   :  { %543 = vsyncpa [#allocation3], 1 }
 0x11b   :  { %545 = vsyncpa [#allocation3 + $0x1], 1 }
 0x11c   :  { %546 = vsyncpa [#allocation4], 1 }
 0x11d   :  { %548 = vsyncpa [#allocation4 + $0x1], 1 }

</bundles_post_ra>
